<compile_context>
chip_gen: v7x
topology: tpu7x:2x2x1
jax: 0.10.0
libtpu: 0.0.40
codegen_flags: <defaults>
</compile_context>

<pallas_src>
import functools

import jax
import jax.numpy as jnp
from jax.experimental import pallas as pl
from jax.experimental.pallas import tpu as pltpu

_BASE_LANES = 128
_TARGET_BLOCK_BYTES = 4 * 1024 * 1024   # ~4 MiB per block (2 arrays x 2 buffers = 16 MiB)
_VMEM_LIMIT_BYTES = 40 * 1024 * 1024    # explicit scoped-VMEM limit; safe on v5e/v6e/v7x


def _round_up(x, m):
    return ((x + m - 1) // m) * m


def _bf16_native_ok():
    """bf16 VPU/EUP exists on v6e and newer; v5e and older need f32 compute."""
    try:
        kind = jax.devices()[0].device_kind.lower()
    except Exception:
        return False
    return not any(v in kind for v in ("v2", "v3", "v4", "v5"))


def _swish_kernel(x_ref, o_ref, *, beta, compute_dtype):
    x = x_ref[...].astype(compute_dtype)
    z = x if beta == 1.0 else x * beta           # specialize beta == 1.0
    o_ref[...] = (x * jax.nn.sigmoid(z)).astype(o_ref.dtype)


def _swish_plain(x, beta, compute_dtype):
    xc = x.astype(compute_dtype)
    z = xc if beta == 1.0 else xc * beta
    return (xc * jax.nn.sigmoid(z)).astype(x.dtype)


def swish(x, beta=1.0):
    """Swish / SiLU-with-beta computed in a Pallas TPU kernel.

    Matches torch semantics: y = x * sigmoid(beta * x), same shape/dtype as x.
    """
    orig_shape = x.shape
    dtype = x.dtype
    n = x.size
    if n == 0:
        return x
    beta = float(beta)

    # Compute dtype: native bf16 on bf16-capable chips, f32 otherwise.
    if dtype == jnp.bfloat16 and _bf16_native_ok():
        compute_dtype = jnp.bfloat16
    else:
        compute_dtype = jnp.float32

    flat = x.reshape(-1)
    n_aligned = (n // _BASE_LANES) * _BASE_LANES
    if n_aligned == 0:
        # Fewer than 128 elements: kernel launch overhead dominates; plain JAX.
        return _swish_plain(flat, beta, compute_dtype).reshape(orig_shape)

    itemsize = jnp.dtype(dtype).itemsize
    # Sublane granularity by dtype packing: f32 -> 8, bf16 -> 16, int8/fp8 -> 32.
    sub = max(8, 32 // itemsize)

    # Lane-dense slab: widest last dim that divides the aligned prefix while
    # keeping at least `sub` sublane rows.
    lanes = _BASE_LANES
    for cand in (1024, 512, 256):
        if n_aligned % cand == 0 and (n_aligned // cand) >= sub:
            lanes = cand
            break
    rows = n_aligned // lanes
    head = flat[:n_aligned].reshape(rows, lanes)

    # Row tile: ~4 MiB per block, dtype-aligned, capped at ceil(rows/2) so the
    # parallel grid axis has >= 2 steps (v7x megacore split).  Full-array blocks
    # are used when rows are tiny (always a legal block shape).
    if rows <= sub:
        tile = rows
    else:
        row_tile = _round_up(max(sub, _TARGET_BLOCK_BYTES // (lanes * itemsize)), sub)
        half = max(sub, _round_up(pl.cdiv(rows, 2), sub))
        tile = min(row_tile, half)
        if tile >= rows:
            tile = rows
    grid = pl.cdiv(rows, tile)

    kernel = functools.partial(_swish_kernel, beta=beta, compute_dtype=compute_dtype)

    head_out = pl.pallas_call(
        kernel,
        out_shape=jax.ShapeDtypeStruct((rows, lanes), dtype),
        grid_spec=pltpu.PrefetchScalarGridSpec(
            num_scalar_prefetch=0,
            grid=(grid,),
            in_specs=[pl.BlockSpec((tile, lanes), lambda i: (i, 0))],
            out_specs=pl.BlockSpec((tile, lanes), lambda i: (i, 0)),
        ),
        compiler_params=pltpu.CompilerParams(
            dimension_semantics=("parallel",),
            vmem_limit_bytes=_VMEM_LIMIT_BYTES,
        ),
    )(head)

    if n_aligned == n:
        return head_out.reshape(orig_shape)

    # <=127-element ragged tail handled in plain JAX — avoids the jnp.pad of
    # the whole input and the full-output slice (3x HBM traffic) of before.
    # TODO(synk): fold the tail into the kernel with a masked pltpu.store to
    # also avoid the small output concatenate copy.
    tail_out = _swish_plain(flat[n_aligned:], beta, compute_dtype)
    return jnp.concatenate([head_out.reshape(-1), tail_out]).reshape(orig_shape)


if __name__ == "__main__":
    key = jax.random.PRNGKey(0)
    # NCHW input, same convention as the PyTorch module's typical use.
    x = jax.random.normal(key, (2, 4, 16, 16), dtype=jnp.float32)

    # beta = 1.0 (Swish() default).
    y = jax.block_until_ready(swish(x))
    y_ref = x * jax.nn.sigmoid(x)
    assert y.shape == x.shape and y.dtype == x.dtype
    assert jnp.allclose(y, y_ref, atol=1e-6, rtol=1e-6)

    # Non-default beta.
    y2 = jax.block_until_ready(swish(x, beta=1.5))
    assert jnp.allclose(y2, x * jax.nn.sigmoid(1.5 * x), atol=1e-6, rtol=1e-6)

    # Lane-unaligned size exercises the aligned-prefix + plain-JAX-tail path.
    x3 = jax.random.normal(jax.random.PRNGKey(1), (3, 67), dtype=jnp.float32)
    y3 = jax.block_until_ready(swish(x3))
    assert jnp.allclose(y3, x3 * jax.nn.sigmoid(x3), atol=1e-6, rtol=1e-6)

    print("KERNEL_OK")
</pallas_src>

<mosaic_0001>
module attributes {stable_mosaic.version = 11 : i64} {
  func.func @_swish_kernel(%arg0: i32, %arg1: memref<8x256xf32, #tpu.memory_space<vmem>>, %arg2: memref<8x256xf32, #tpu.memory_space<vmem>>) attributes {dimension_semantics = [#tpu.dimension_semantics<parallel>], iteration_bounds = array<i64: 1>, scalar_prefetch = 0 : i64, scratch_operands = 0 : i64, tpu.core_type = #tpu.core_type<tc>, window_params = [{transform_indices = @transform_0, window_bounds = array<i64: 8, 256>}, {transform_indices = @transform_1, window_bounds = array<i64: 8, 256>}]} {
    %c0 = arith.constant 0 : index
    %c0_0 = arith.constant 0 : index
    %0 = vector.load %arg1[%c0, %c0_0] : memref<8x256xf32, #tpu.memory_space<vmem>>, vector<8x256xf32>
    %1 = arith.negf %0 : vector<8x256xf32>
    %2 = math.exp %1 : vector<8x256xf32>
    %cst = arith.constant 1.000000e+00 : f32
    %3 = vector.broadcast %cst : f32 to vector<8x256xf32>
    %4 = arith.addf %3, %2 : vector<8x256xf32>
    %5 = arith.divf %3, %4 : vector<8x256xf32>
    %6 = arith.mulf %0, %5 : vector<8x256xf32>
    %c0_1 = arith.constant 0 : index
    %c0_2 = arith.constant 0 : index
    %7 = vector.load %arg2[%c0_1, %c0_2] : memref<8x256xf32, #tpu.memory_space<vmem>>, vector<8x256xf32>
    tpu.vector_store %arg2[%c0_1, %c0_2], %6 {strides = array<i32>} : memref<8x256xf32, #tpu.memory_space<vmem>>, vector<8x256xf32>,
    return
  }
  func.func @transform_0(%arg0: i32) -> (i32, i32) {
    %c0_i32 = arith.constant 0 : i32
    %c0_i32_0 = arith.constant 0 : i32
    return %arg0, %c0_i32 : i32, i32
  }
  func.func @transform_1(%arg0: i32) -> (i32, i32) {
    %c0_i32 = arith.constant 0 : i32
    %c0_i32_0 = arith.constant 0 : i32
    return %arg0, %c0_i32 : i32, i32
  }
}

</mosaic_0001>

<bundles_post_ra>
// kernel: tpu_custom_call.1
= control target key start
LH: loop header
LB: loop body
LE: loop exit
PB: predicated region body
PF: predicated region fallthrough
CT: control target
= control target key end

     0   :  { %6 = vsyncpa [#allocation3], 0  ;;  %s150_s0 = inlined_call_operand.hbm [shape: f32[8,256], index: 0, kind: input, shape index: {}]   ;;  %s151_s1 = inlined_call_operand.hbm [shape: f32[8,256], index: 1, kind: output, shape index: {}]  }
   0x1   :  { %7 = vsyncpa [#allocation4], 0  ;;  %s114_s6 = smov [#allocation2]   ;;  %s66_s10 = scalar_lea.hbm %s150_s0, 256 }
   0x2   :  { %s14_s7 = sshll.u32 %s114_s6, 4  ;;  %p67_p0 = scmp.ne.s32.totalorder %s150_s0, %s66_s10  ;;  %s15_s7 = int_to_ptr.vmem [resolvable:$true] %s14_s7 }
   0x3   :  { %p70_p1 = scmp.lt.u32.totalorder %s66_s10, %s150_s0 }
   0x5   :  { %p72_p2 = pnand %p70_p1, %p67_p0 }
   0x7   :  { %75 = shalt.err (!%p72_p2)
}
   0x8   :  { %s76_s15 = scalar_lea.vmem %s15_s7, 256  ;;  %p81_p4 = scmp.lt.s32.totalorder %s15_s7, %s15_s7 }
   0x9   :  { %p77_p3 = scmp.ne.s32.totalorder %s15_s7, %s76_s15  ;;  %p82_p5 = scmp.lt.s32.totalorder %s76_s15, %s76_s15 }
   0xb   :  { %p83_p6 = por %p82_p5, %p81_p4 }
   0xd   :  { %p84_p7 = pnand %p83_p6, %p77_p3 }
   0xf   :  { %87 = shalt.err (!%p84_p7)
}
  0x10   :  { %17 = dma.hbm_to_vmem [thread:$0]  %s150_s0, 256, %s15_s7, [#allocation3]  }
  0x11   :  { %110 = dma.done.wait [#allocation3], 256  }
  0x12   :  { %111 = vsyncadd [#allocation3], 4294967040  ;;  %v21_v0 = vld [vmem:[#allocation2] sm:$0xff]  ;;  %v22_v1 = vld [vmem:[#allocation2 + $0x8] sm:$0xff]  ;;  %s115_s18 = smov [#allocation5]  }
  0x13   :  { %v54_v2 = vmul.f32 -1.442695, %v21_v0  ;;  %v55_v3 = vmul.f32 -1.442695, %v22_v1  ;;  %s45_s19 = sshll.u32 %s115_s18, 4  ;;  %s46_s19 = int_to_ptr.vmem [resolvable:$true] %s45_s19 }
  0x14   :  { %s88_s0 = scalar_lea.vmem %s46_s19, 256  ;;  %p93_p9 = scmp.lt.s32.totalorder %s46_s19, %s46_s19 }
  0x15   :  { %58 = vpow2.f32 %v54_v2  ;;  %p89_p8 = scmp.ne.s32.totalorder %s46_s19, %s88_s0  ;;  %p94_p10 = scmp.lt.s32.totalorder %s88_s0, %s88_s0 }
  0x16   :  { %60 = vpow2.f32 %v55_v3 }
  0x17   :  { %p95_p11 = por %p94_p10, %p93_p9 }
  0x19   :  { %p96_p12 = pnand %p95_p11, %p89_p8 }
  0x1f   :  { %v59_v4 = vpop.eup %58 }
  0x20   :  { %v61_v5 = vpop.eup %60  ;;  %v29_v6 = vadd.f32 1.0, %v59_v4 }
  0x21   :  { %v30_v7 = vadd.f32 1.0, %v61_v5 }
  0x22   :  { %62 = vrcp.f32 %v29_v6 }
  0x23   :  { %64 = vrcp.f32 %v30_v7 }
  0x2c   :  { %v63_v8 = vpop.eup %62 }
  0x2d   :  { %v65_v9 = vpop.eup %64  ;;  %v35_v10 = vmul.f32 %v63_v8, %v21_v0 }
  0x2e   :  { %v36_v11 = vmul.f32 %v65_v9, %v22_v1 }
  0x2f   :  { %37 = vst [vmem:[#allocation5] sm:$0xff] %v35_v10 }
  0x30   :  { %38 = vst [vmem:[#allocation5 + $0x8] sm:$0xff] %v36_v11 }
  0x31   :  { %99 = shalt.err (!%p96_p12)
}
  0x32   :  { %s100_s22 = scalar_lea.hbm %s151_s1, 256 }
  0x33   :  { %p101_p13 = scmp.ne.s32.totalorder %s151_s1, %s100_s22  ;;  %p104_p0 = scmp.lt.u32.totalorder %s100_s22, %s151_s1 }
  0x35   :  { %p106_p1 = pnand %p104_p0, %p101_p13 }
  0x37   :  { %109 = shalt.err (!%p106_p1)
}
  0x38   :  { %48 = dma.vmem_to_hbm [thread:$0]  %s46_s19, 256, %s151_s1, [#allocation4]  }
  0x39   :  { %112 = dma.done.wait [#allocation4], 256  }
  0x3a   :  { %113 = vsyncadd [#allocation4], 4294967040 }
  0x3b   :  { %52 = vsyncpa [#allocation3], 1 }
  0x3c   :  { %53 = vsyncpa [#allocation4], 1 }

</bundles_post_ra>
